<compile_context>
chip_gen: v7x
topology: tpu7x:2x2x1
jax: 0.10.0
libtpu: 0.0.40
codegen_flags: <defaults>
</compile_context>

<pallas_src>
import functools

import jax
import jax.numpy as jnp
from jax.experimental import pallas as pl
from jax.experimental.pallas import tpu as pltpu


def _emd_loss_kernel(x_ref, y_ref, out_ref, tri_ref, acc_ref, *, dist_r,
                     use_l1, l1loss_coef, batch, tile_b, need_mask, mxu_dtype):
    i = pl.program_id(0)

    @pl.when(i == 0)
    def _():
        # Hoisted triangular (cumsum) operand + accumulator init: done once,
        # reused by every grid step.
        ck = tri_ref.shape[0]
        rk = jax.lax.broadcasted_iota(jnp.int32, (ck, ck), 0)
        cc = jax.lax.broadcasted_iota(jnp.int32, (ck, ck), 1)
        tri_ref[...] = (rk <= cc).astype(tri_ref.dtype)
        acc_ref[...] = jnp.zeros_like(acc_ref)

    x = x_ref[...].astype(jnp.float32)            # (tile_b, C)
    y = y_ref[...].astype(jnp.float32)            # (tile_b, C)
    c = x.shape[1]
    ck = tri_ref.shape[0]
    n_chunks = c // ck

    # cumsum(y) - cumsum(x) == cumsum(y - x): one MXU matmul (per chunk).
    diff = y - x                                   # (tile_b, C) f32
    tri = tri_ref[...]                             # (ck, ck) mxu_dtype

    # Chunked cumulative sum along C: per-chunk local cumsum on the MXU plus
    # a running per-row carry (= sum of all earlier chunks).
    carry = jnp.zeros((diff.shape[0], 1), jnp.float32)
    row_acc = jnp.zeros((diff.shape[0], 1), jnp.float32)
    for j in range(n_chunks):
        d = diff[:, j * ck:(j + 1) * ck]
        cdf = jnp.dot(d.astype(mxu_dtype), tri,
                      preferred_element_type=jnp.float32) + carry
        if dist_r == 2:
            row_acc = row_acc + jnp.sum(cdf * cdf, axis=-1, keepdims=True)
        else:
            row_acc = row_acc + jnp.sum(jnp.abs(cdf), axis=-1, keepdims=True)
        if j + 1 < n_chunks:
            carry = carry + jnp.sum(d, axis=-1, keepdims=True)

    if dist_r == 2:
        samplewise = jnp.sqrt(row_acc * (1.0 / c))           # (tile_b, 1)
    else:
        samplewise = row_acc * (1.0 / c)

    if use_l1:
        # rate = [1..C]; |mean(x*rate) - mean(y*rate)| == |mean(diff*rate)|.
        rate = (jax.lax.broadcasted_iota(jnp.int32, (1, c), 1)
                .astype(jnp.float32) + 1.0)                   # (1, C)
        l1_rows = jnp.abs(
            jnp.sum(diff * rate, axis=-1, keepdims=True) * (1.0 / c))
        samplewise = samplewise + l1_rows * l1loss_coef

    if need_mask:
        # Ragged final tile: padded rows hold unspecified data.  Use a cheap
        # (tile_b, 1) row-validity SELECT on the per-row results (never a
        # multiply-by-mask) so garbage/NaN padding rows cannot propagate.
        rows = (jax.lax.broadcasted_iota(jnp.int32, (samplewise.shape[0], 1), 0)
                + i * tile_b)
        samplewise = jnp.where(rows < batch, samplewise, 0.0)

    # Accumulate the undivided per-tile sum; divide by B once at the end.
    acc_ref[...] += jnp.sum(samplewise, keepdims=True)        # (1, 1)

    @pl.when(i == pl.num_programs(0) - 1)
    def _():
        out_ref[...] = acc_ref[...] * (1.0 / batch)


def emd_loss_pallas(x, y_true, *, dist_r=2, use_l1loss=True, l1loss_coef=0.0,
                    tile_b=1024, c_chunk=512, mxu_dtype=jnp.bfloat16):
    """Pallas implementation of emd_loss.forward. Returns a scalar."""
    assert x.ndim == 2 and y_true.ndim == 2
    assert x.shape[0] == y_true.shape[0] and x.shape[0] > 0
    assert x.shape[1] == y_true.shape[1]
    B, C = x.shape

    # Cumsum chunking along C: dense when C is small or not divisible.
    # TODO(synk): pad / ragged-chunk support for large C not divisible by c_chunk.
    ck = C if (C <= c_chunk or C % int(c_chunk) != 0) else int(c_chunk)

    # Batch tile sized against a conservative VMEM budget that is safe on all
    # generations (double-buffered x and y tiles + the tri scratch).
    mxu_itemsize = jnp.dtype(mxu_dtype).itemsize
    in_itemsize = jnp.dtype(x.dtype).itemsize
    vmem_budget = 40 * 1024 * 1024
    per_row = 2 * 2 * C * in_itemsize               # 2 inputs x double buffer
    tri_bytes = ck * ck * mxu_itemsize
    cap = max(8, (vmem_budget - tri_bytes) // per_row)
    tile_b = min(int(tile_b), B, int(cap))
    if tile_b < B:
        tile_b = max(8, (tile_b // 8) * 8)
    grid_b = pl.cdiv(B, tile_b)
    need_mask = (B % tile_b) != 0

    kernel = functools.partial(
        _emd_loss_kernel,
        dist_r=dist_r,
        # Elide the L1 path at trace time when the coefficient is zero.
        use_l1=bool(use_l1loss) and float(l1loss_coef) != 0.0,
        l1loss_coef=float(l1loss_coef),
        batch=B,
        tile_b=tile_b,
        need_mask=need_mask,
        mxu_dtype=mxu_dtype,
    )

    out = pl.pallas_call(
        kernel,
        out_shape=jax.ShapeDtypeStruct((1, 1), jnp.float32),
        grid=(grid_b,),
        in_specs=[
            pl.BlockSpec((tile_b, C), lambda i: (i, 0)),
            pl.BlockSpec((tile_b, C), lambda i: (i, 0)),
        ],
        out_specs=pl.BlockSpec((1, 1), lambda i: (0, 0)),
        scratch_shapes=[
            pltpu.VMEM((ck, ck), mxu_dtype),     # hoisted triangular operand
            pltpu.VMEM((1, 1), jnp.float32),     # running (undivided) loss sum
        ],
        compiler_params=pltpu.CompilerParams(
            dimension_semantics=("arbitrary",),
            vmem_limit_bytes=48 * 1024 * 1024),
    )(x, y_true)
    return out[0, 0]


def emd_loss_ref(x, y_true, *, dist_r=2, use_l1loss=True, l1loss_coef=0.0):
    """Pure-JAX reference mirroring the PyTorch module."""
    cdf_x = jnp.cumsum(x, axis=-1)
    cdf_y = jnp.cumsum(y_true, axis=-1)
    if dist_r == 2:
        samplewise = jnp.sqrt(jnp.mean((cdf_y - cdf_x) ** 2, axis=-1))
    else:
        samplewise = jnp.mean(jnp.abs(cdf_y - cdf_x), axis=-1)
    loss = jnp.mean(samplewise)
    if use_l1loss:
        rate = jnp.arange(1, x.shape[1] + 1, dtype=x.dtype)
        x_mean = jnp.mean(x * rate, axis=-1)
        y_mean = jnp.mean(y_true * rate, axis=-1)
        loss = loss + jnp.mean(jnp.abs(x_mean - y_mean)) * l1loss_coef
    return loss


def _make_inputs(key, b, c):
    kx, ky = jax.random.split(key)
    x = jax.nn.softmax(jax.random.normal(kx, (b, c), dtype=jnp.float32), axis=-1)
    y = jax.nn.softmax(jax.random.normal(ky, (b, c), dtype=jnp.float32), axis=-1)
    return x, y


if __name__ == "__main__":
    key = jax.random.PRNGKey(0)
    k1, k2, k3, k4 = jax.random.split(key, 4)
    # bf16-MXU tolerance (f32 accumulation; only diff is rounded to bf16).
    BF16_TOL = dict(atol=2e-3, rtol=2e-2)

    # 1) Demo-scale, L2 distance, coef=0 (L1 path elided at trace time).
    x, y = _make_inputs(k1, 8, 16)
    got = jax.block_until_ready(
        emd_loss_pallas(x, y, dist_r=2, use_l1loss=True, l1loss_coef=0.0))
    want = emd_loss_ref(x, y, dist_r=2, use_l1loss=True, l1loss_coef=0.0)
    assert jnp.allclose(got, want, **BF16_TOL), (got, want)

    # 2) Batch-tiled path with a ragged final tile + active L1 term (bf16 MXU).
    x, y = _make_inputs(k2, 20, 16)
    got = jax.block_until_ready(
        emd_loss_pallas(x, y, dist_r=2, use_l1loss=True, l1loss_coef=0.3,
                        tile_b=8))
    want = emd_loss_ref(x, y, dist_r=2, use_l1loss=True, l1loss_coef=0.3)
    assert jnp.allclose(got, want, **BF16_TOL), (got, want)

    # 2b) Same inputs with the f32 MXU escape hatch: exact-path validation.
    got = jax.block_until_ready(
        emd_loss_pallas(x, y, dist_r=2, use_l1loss=True, l1loss_coef=0.3,
                        tile_b=8, mxu_dtype=jnp.float32))
    assert jnp.allclose(got, want, atol=1e-5, rtol=1e-5), (got, want)

    # 3) L1 distance variant.
    x, y = _make_inputs(k3, 8, 16)
    got = jax.block_until_ready(
        emd_loss_pallas(x, y, dist_r=1, use_l1loss=False, l1loss_coef=0.0))
    want = emd_loss_ref(x, y, dist_r=1, use_l1loss=False, l1loss_coef=0.0)
    assert jnp.allclose(got, want, **BF16_TOL), (got, want)

    # 4) Chunked-C cumsum path (C=256, ck=128) + ragged tile + L1 term.
    x, y = _make_inputs(k4, 40, 256)
    got = jax.block_until_ready(
        emd_loss_pallas(x, y, dist_r=2, use_l1loss=True, l1loss_coef=0.3,
                        tile_b=16, c_chunk=128))
    want = emd_loss_ref(x, y, dist_r=2, use_l1loss=True, l1loss_coef=0.3)
    assert jnp.allclose(got, want, **BF16_TOL), (got, want)

    print("KERNEL_OK")
</pallas_src>

<mosaic_0001>
module attributes {stable_mosaic.version = 11 : i64} {
  func.func @_emd_loss_kernel(%arg0: i32, %arg1: memref<8x16xf32, #tpu.memory_space<vmem>>, %arg2: memref<8x16xf32, #tpu.memory_space<vmem>>, %arg3: memref<1x1xf32, #tpu.memory_space<vmem>>, %arg4: memref<16x16xbf16, #tpu.memory_space<vmem>>, %arg5: memref<1x1xf32, #tpu.memory_space<vmem>>) attributes {dimension_semantics = [#tpu.dimension_semantics<arbitrary>], iteration_bounds = array<i64: 1>, scalar_prefetch = 0 : i64, scratch_operands = 2 : i64, tpu.core_type = #tpu.core_type<tc>, window_params = [{transform_indices = @transform_0, window_bounds = array<i64: 8, 16>}, {transform_indices = @transform_1, window_bounds = array<i64: 8, 16>}, {pipeline_mode = #tpu.pipeline_mode<synchronous>, transform_indices = @transform_2, window_bounds = array<i64: 1, 1>}]} {
    %c0_i32 = arith.constant 0 : i32
    %0 = arith.cmpi eq, %arg0, %c0_i32 : i32
    %1 = arith.extui %0 : i1 to i32
    %c0_i32_0 = arith.constant 0 : i32
    %2 = arith.cmpi ne, %1, %c0_i32_0 : i32
    scf.if %2 {
      %31 = tpu.iota {dimensions = array<i32: 0>} : vector<16x16xi32>
      %32 = tpu.iota {dimensions = array<i32: 1>} : vector<16x16xi32>
      %33 = arith.cmpi sle, %31, %32 : vector<16x16xi32>
      %34 = arith.extui %33 : vector<16x16xi1> to vector<16x16xi32>
      %35 = arith.sitofp %34 : vector<16x16xi32> to vector<16x16xf32>
      %36 = arith.truncf %35 : vector<16x16xf32> to vector<16x16xbf16>
      %c0_17 = arith.constant 0 : index
      %c0_18 = arith.constant 0 : index
      %37 = vector.load %arg4[%c0_17, %c0_18] : memref<16x16xbf16, #tpu.memory_space<vmem>>, vector<16x16xbf16>
      tpu.vector_store %arg4[%c0_17, %c0_18], %36 {strides = array<i32>} : memref<16x16xbf16, #tpu.memory_space<vmem>>, vector<16x16xbf16>,
      %cst_19 = arith.constant 0.000000e+00 : f32
      %38 = vector.broadcast %cst_19 : f32 to vector<1x1xf32>
      %c0_20 = arith.constant 0 : index
      %c0_21 = arith.constant 0 : index
      %39 = vector.load %arg5[%c0_20, %c0_21] : memref<1x1xf32, #tpu.memory_space<vmem>>, vector<1x1xf32>
      tpu.vector_store %arg5[%c0_20, %c0_21], %38 {strides = array<i32>} : memref<1x1xf32, #tpu.memory_space<vmem>>, vector<1x1xf32>,
    } else {
    }
    %c0 = arith.constant 0 : index
    %c0_1 = arith.constant 0 : index
    %3 = vector.load %arg1[%c0, %c0_1] : memref<8x16xf32, #tpu.memory_space<vmem>>, vector<8x16xf32>
    %c0_2 = arith.constant 0 : index
    %c0_3 = arith.constant 0 : index
    %4 = vector.load %arg2[%c0_2, %c0_3] : memref<8x16xf32, #tpu.memory_space<vmem>>, vector<8x16xf32>
    %5 = arith.subf %4, %3 : vector<8x16xf32>
    %c0_4 = arith.constant 0 : index
    %c0_5 = arith.constant 0 : index
    %6 = vector.load %arg4[%c0_4, %c0_5] : memref<16x16xbf16, #tpu.memory_space<vmem>>, vector<16x16xbf16>
    %cst = arith.constant 0.000000e+00 : f32
    %7 = vector.broadcast %cst : f32 to vector<8x1xf32>
    %cst_6 = arith.constant 0.000000e+00 : f32
    %8 = vector.broadcast %cst_6 : f32 to vector<8x1xf32>
    %9 = arith.truncf %5 : vector<8x16xf32> to vector<8x16xbf16>
    %cst_7 = arith.constant dense<0.000000e+00> : vector<8x16xf32>
    %10 = tpu.matmul %9, %6, %cst_7 {dimension_numbers = #tpu.dot_dimension_numbers<[1], [0], [0], [1], [0, 0, 1, 1], [], []>} : vector<8x16xbf16>, vector<16x16xbf16>, vector<8x16xf32> -> vector<8x16xf32>
    %11 = vector.broadcast %7 : vector<8x1xf32> to vector<8x16xf32>
    %12 = arith.addf %10, %11 : vector<8x16xf32>
    %13 = arith.mulf %12, %12 : vector<8x16xf32>
    %cst_8 = arith.constant dense<0.000000e+00> : vector<8xf32>
    %14 = vector.multi_reduction <add>, %13, %cst_8 [1] : vector<8x16xf32> to vector<8xf32>
    %15 = vector.shape_cast %14 : vector<8xf32> to vector<8x1xf32>
    %16 = arith.addf %8, %15 : vector<8x1xf32>
    %cst_9 = arith.constant 6.250000e-02 : f32
    %17 = vector.broadcast %cst_9 : f32 to vector<8x1xf32>
    %18 = arith.mulf %16, %17 : vector<8x1xf32>
    %19 = math.sqrt %18 : vector<8x1xf32>
    %c0_10 = arith.constant 0 : index
    %c0_11 = arith.constant 0 : index
    %20 = vector.load %arg5[%c0_10, %c0_11] : memref<1x1xf32, #tpu.memory_space<vmem>>, vector<1x1xf32>
    %21 = vector.shape_cast %19 : vector<8x1xf32> to vector<1x8x1xf32>
    %cst_12 = arith.constant dense<0.000000e+00> : vector<1xf32>
    %22 = vector.multi_reduction <add>, %21, %cst_12 [1, 2] : vector<1x8x1xf32> to vector<1xf32>
    %23 = vector.shape_cast %22 : vector<1xf32> to vector<1x1x1xf32>
    %24 = vector.extract %23[0, 0, 0] : f32 from vector<1x1x1xf32>
    %25 = vector.broadcast %24 : f32 to vector<1x1xf32>
    %26 = arith.addf %20, %25 : vector<1x1xf32>
    %c0_13 = arith.constant 0 : index
    %c0_14 = arith.constant 0 : index
    %27 = vector.load %arg5[%c0_13, %c0_14] : memref<1x1xf32, #tpu.memory_space<vmem>>, vector<1x1xf32>
    tpu.vector_store %arg5[%c0_13, %c0_14], %26 {strides = array<i32>} : memref<1x1xf32, #tpu.memory_space<vmem>>, vector<1x1xf32>,
    %c0_i32_15 = arith.constant 0 : i32
    %28 = arith.cmpi eq, %arg0, %c0_i32_15 : i32
    %29 = arith.extui %28 : i1 to i32
    %c0_i32_16 = arith.constant 0 : i32
    %30 = arith.cmpi ne, %29, %c0_i32_16 : i32
    scf.if %30 {
      %c0_17 = arith.constant 0 : index
      %c0_18 = arith.constant 0 : index
      %31 = vector.load %arg5[%c0_17, %c0_18] : memref<1x1xf32, #tpu.memory_space<vmem>>, vector<1x1xf32>
      %cst_19 = arith.constant 1.250000e-01 : f32
      %32 = vector.broadcast %cst_19 : f32 to vector<1x1xf32>
      %33 = arith.mulf %31, %32 : vector<1x1xf32>
      %c0_20 = arith.constant 0 : index
      %c0_21 = arith.constant 0 : index
      %34 = vector.load %arg3[%c0_20, %c0_21] : memref<1x1xf32, #tpu.memory_space<vmem>>, vector<1x1xf32>
      tpu.vector_store %arg3[%c0_20, %c0_21], %33 {strides = array<i32>} : memref<1x1xf32, #tpu.memory_space<vmem>>, vector<1x1xf32>,
    } else {
    }
    return
  }
  func.func @transform_0(%arg0: i32) -> (i32, i32) {
    %c0_i32 = arith.constant 0 : i32
    %c0_i32_0 = arith.constant 0 : i32
    return %arg0, %c0_i32 : i32, i32
  }
  func.func @transform_1(%arg0: i32) -> (i32, i32) {
    %c0_i32 = arith.constant 0 : i32
    %c0_i32_0 = arith.constant 0 : i32
    return %arg0, %c0_i32 : i32, i32
  }
  func.func @transform_2(%arg0: i32) -> (i32, i32) {
    %c0_i32 = arith.constant 0 : i32
    %c0_i32_0 = arith.constant 0 : i32
    %c0_i32_1 = arith.constant 0 : i32
    return %c0_i32, %c0_i32_0 : i32, i32
  }
}

</mosaic_0001>

<bundles_post_ra>
// kernel: tpu_custom_call.1
= control target key start
LH: loop header
LB: loop body
LE: loop exit
PB: predicated region body
PF: predicated region fallthrough
CT: control target
= control target key end

     0   :  { %7 = vsyncpa [#allocation5], 0  ;;  %s308_s0 = inlined_call_operand.hbm [shape: f32[8,16], index: 0, kind: input, shape index: {}]   ;;  %s309_s1 = inlined_call_operand.hbm [shape: f32[8,16], index: 1, kind: input, shape index: {}]   ;;  %s310_s2 = inlined_call_operand.hbm [shape: f32[1,1], index: 2, kind: output, shape index: {}]  }
   0x1   :  { %8 = vsyncpa [#allocation8], 0 }
   0x2   :  { %9 = vsyncpa [#allocation6], 0  ;;  %s249_s9 = smov [#allocation4]   ;;  %s250_s11 = smov [#allocation7]  }
   0x3   :  { %s16_s10 = sshll.u32 %s249_s9, 4  ;;  %s26_s12 = sshll.u32 %s250_s11, 4  ;;  %s17_s10 = int_to_ptr.vmem [resolvable:$true] %s16_s10  ;;  %s27_s12 = int_to_ptr.vmem [resolvable:$true] %s26_s12 }
   0x4   :  { %s177_s15 = scalar_lea.hbm %s308_s0, 128 }
   0x5   :  { %p178_p0 = scmp.ne.s32.totalorder %s308_s0, %s177_s15  ;;  %p181_p1 = scmp.lt.u32.totalorder %s177_s15, %s308_s0 }
   0x7   :  { %p183_p2 = pnand %p181_p1, %p178_p0 }
   0x9   :  { %186 = shalt.err (!%p183_p2)
}
   0xa   :  { %s187_s20 = scalar_lea.vmem %s17_s10, 128  ;;  %p192_p4 = scmp.lt.s32.totalorder %s17_s10, %s17_s10 }
   0xb   :  { %p188_p3 = scmp.ne.s32.totalorder %s17_s10, %s187_s20  ;;  %p193_p5 = scmp.lt.s32.totalorder %s187_s20, %s187_s20 }
   0xd   :  { %p194_p6 = por %p193_p5, %p192_p4 }
   0xf   :  { %p195_p7 = pnand %p194_p6, %p188_p3 }
  0x11   :  { %198 = shalt.err (!%p195_p7)
}
  0x12   :  { %19 = dma.hbm_to_vmem [thread:$0]  %s308_s0, 128, %s17_s10, [#allocation5]  }
  0x13   :  { %s199_s25 = scalar_lea.hbm %s309_s1, 128 }
  0x14   :  { %p200_p8 = scmp.ne.s32.totalorder %s309_s1, %s199_s25  ;;  %p203_p9 = scmp.lt.u32.totalorder %s199_s25, %s309_s1 }
  0x16   :  { %p205_p10 = pnand %p203_p9, %p200_p8 }
  0x18   :  { %208 = shalt.err (!%p205_p10)
}
  0x19   :  { %s209_s30 = scalar_lea.vmem %s27_s12, 128  ;;  %p214_p12 = scmp.lt.s32.totalorder %s27_s12, %s27_s12 }
  0x1a   :  { %p210_p11 = scmp.ne.s32.totalorder %s27_s12, %s209_s30  ;;  %p215_p13 = scmp.lt.s32.totalorder %s209_s30, %s209_s30 }
  0x1c   :  { %p216_p0 = por %p215_p13, %p214_p12 }
  0x1e   :  { %p217_p1 = pnand %p216_p0, %p210_p11 }
  0x20   :  { %220 = shalt.err (!%p217_p1)
}
  0x21   :  { %29 = dma.hbm_to_vmem [thread:$0]  %s309_s1, 128, %s27_s12, [#allocation8]  }
  0x22   :  { %243 = dma.done.wait [#allocation5], 128  }
  0x23   :  { %244 = vsyncadd [#allocation5], 4294967168 }
  0x24   :  { %245 = dma.done.wait [#allocation8], 128  }
  0x25   :  { %246 = vsyncadd [#allocation8], 4294967168  ;;  %v41_v0 = vlaneseq  ;;  %v251_v1 = vmov 0.0   ;;  %vm252_vm0 = vmmov 0   ;;  %vm53_vm3 = vcmask 130048   ;;  %v57_v8 = vld [vmem:[#allocation4] sm:$0xff] }
  0x26   :  { %162 = vmatprep.subr.bf16.mxu0 %v251_v1  ;;  %164 = vmatprep.mubr.msk.bf16.mxu0 %vm252_vm0, %v251_v1  ;;  %v58_v9 = vld [vmem:[#allocation7] sm:$0xff]  ;;  %vm120_vm5 = vcmask 7168   ;;  %vm55_vm7 = vcmask 0   ;;  %s253_s4 = smov [#allocation9]  }
  0x27   :  { %v42_v2 = vshrl.u32 %v41_v0, 7  ;;  %v45_v3 = vand.u32 127, %v41_v0  ;;  %v59_v10 = vsub.f32 %v58_v9, %v57_v8  ;;  %56 = vst.msk [vmem:[#allocation3] sm:$0x1] %vm55_vm7, %v251_v1  ;;  %s147_s5 = sshll.u32 %s253_s4, 4  ;;  %s148_s5 = int_to_ptr.vmem [resolvable:$true] %s147_s5 }
  0x28   :  { %s221_s6 = scalar_lea.vmem %s148_s5, 16  ;;  %s225_s7 = scalar_lea.vmem %s148_s5, 32 }
  0x29   :  { %v43_v4 = vadd.s32 8, %v42_v2  ;;  %vm46_vm1 = vcmp.le.s32.totalorder %v42_v2, %v45_v3  ;;  %v61_v12 = vpack.c.bf16 %v59_v10, %v59_v10  ;;  %p222_p2 = scmp.ne.s32.totalorder %s148_s5, %s221_s6  ;;  %p226_p3 = scmp.lt.s32.totalorder %s148_s5, %s148_s5 }
  0x2a   :  { %v157_v5 = vsel %vm46_vm1, 1.0, %v251_v1  ;;  %p227_p4 = scmp.lt.s32.totalorder %s225_s7, %s221_s6 }
  0x2b   :  { %vm47_vm2 = vcmp.le.s32.totalorder %v43_v4, %v45_v3 }
  0x2c   :  { %v158_v6 = vsel %vm47_vm2, 1.0, %v251_v1  ;;  %p228_p5 = por %p227_p4, %p226_p3 }
  0x2d   :  { %v52_v7 = vpack.c.bf16 %v158_v6, %v157_v5 }
  0x2e   :  { %v119_v34 = vld [vmem:[#allocation3] sm:$0x1]  ;;  %p229_p6 = pnand %p228_p5, %p222_p2 }
  0x2f   :  { %54 = vst.msk [vmem:[#allocation2] sm:$0xff] %vm53_vm3, %v52_v7 }
  0x36   :  { %v60_v11 = vld [vmem:[#allocation2] sm:$0xff] }
  0x37   :  { %163 = vmatpush3.bf16.msra.mxu0 %v60_v11 }
  0x3a   :  { %165 = vmatmul.mubr.msk.bf16.vlgmr.msra.gmra.mrb[0].mxu0 %vm53_vm3, %v61_v12 }
 0x10d   :  { %v100_v13 = vpop.f32.mrb[0].mxu0 }
 0x10e   :  { %v106_v14 = vmul.f32 %v100_v13, %v100_v13  ;;  %v166_v15 = vpop.f32.mrb[1].mxu0 }
 0x10f   :  { %v103_v16 = vpop.f32.mrb[2].mxu0 }
 0x110   :  { %v167_v17 = vpop.f32.mrb[3].mxu0  ;;  %v107_v18 = vsel %vm53_vm3, %v106_v14, 0.0 }
 0x111   :  { %108 = vadd.xlane.f32.xlu0 %v107_v18 }
 0x19e   :  { %v109_v19 = vpop.xlane.xlu0 %108 }
 0x19f   :  { %v111_v20 = vmul.f32 0.0625, %v109_v19 }
 0x1a1   :  { %175 = vrsqrt.f32 %v111_v20  ;;  %vm114_vm4 = vcmp.eq.f32.partialorder %v111_v20, inf  ;;  %v117_v23 = vand.u32 2147483648, %v111_v20  ;;  %vm116_vm6 = vcmp.eq.f32.partialorder %v111_v20, 0.0 }
 0x1ab   :  { %v176_v21 = vpop.eup %175 }
 0x1ac   :  { %v113_v22 = vmul.f32 %v176_v21, %v111_v20 }
 0x1ae   :  { %v115_v24 = vsel %vm114_vm4, %v111_v20, %v113_v22 }
 0x1af   :  { %v118_v25 = vsel %vm116_vm6, %v117_v23, %v115_v24 }
 0x1b0   :  { %v121_v26 = vsel %vm120_vm5, %v118_v25, 0.0 }
 0x1b1   :  { %122 = vadd.xlane.f32.xlu0 %v121_v26 }
 0x23e   :  { %v123_v27 = vpop.xlane.xlu0 %122 }
 0x23f   :  { %v124_v28 = vrot.slane %v123_v27, 4 }
 0x241   :  { %v125_v29 = vadd.f32 %v124_v28, %v123_v27 }
 0x243   :  { %v126_v30 = vrot.slane %v125_v29, 2 }
 0x245   :  { %v127_v31 = vadd.f32 %v126_v30, %v125_v29 }
 0x247   :  { %v128_v32 = vrot.slane %v127_v31, 1 }
 0x249   :  { %v129_v33 = vadd.f32 %v128_v32, %v127_v31 }
 0x24b   :  { %168 = vpush %v129_v33 }
 0x27c   :  { %s169_s1 = spop %168 }
 0x27d   :  { %v131_v35 = vstv %s169_s1 }
 0x27e   :  { %v132_v36 = vadd.f32 %v131_v35, %v119_v34 }
 0x280   :  { %134 = vst.msk [vmem:[#allocation3] sm:$0x1] %vm55_vm7, %v132_v36 }
 0x287   :  { %v138_v37 = vld [vmem:[#allocation3] sm:$0x1] }
 0x288   :  { %v139_v38 = vmul.f32 0.125, %v138_v37 }
 0x28a   :  { %140 = vst.msk [vmem:[#allocation9] sm:$0x1] %vm55_vm7, %v139_v38 }
 0x28b   :  { %232 = shalt.err (!%p229_p6)
}
 0x28c   :  { %s233_s10 = scalar_lea.hbm %s310_s2, 16 }
 0x28d   :  { %p234_p7 = scmp.ne.s32.totalorder %s310_s2, %s233_s10  ;;  %p237_p8 = scmp.lt.u32.totalorder %s233_s10, %s310_s2 }
 0x28f   :  { %p239_p9 = pnand %p237_p8, %p234_p7 }
 0x291   :  { %242 = shalt.err (!%p239_p9)
}
 0x292   :  { %150 = dma.vmem_to_hbm [thread:$0]  %s148_s5, 16, %s310_s2, [#allocation6]  }
 0x293   :  { %247 = dma.done.wait [#allocation6], 16  }
 0x294   :  { %248 = vsyncadd [#allocation6], 4294967280 }
 0x295   :  { %154 = vsyncpa [#allocation5], 1 }
 0x296   :  { %155 = vsyncpa [#allocation8], 1 }
 0x297   :  { %156 = vsyncpa [#allocation6], 1 }

</bundles_post_ra>
